<compile_context>
chip_gen: v7x
topology: tpu7x:2x2x1
jax: 0.10.0
libtpu: 0.0.40
codegen_flags: <defaults>
</compile_context>

<pallas_src>
import functools

import jax
import jax.numpy as jnp
from jax.experimental import pallas as pl
from jax.experimental.pallas import tpu as pltpu


def _round_up(x: int, m: int) -> int:
    return -(-x // m) * m


def _apply_act(h, act_type):
    if act_type == 1:
        return jnp.maximum(h, 0.0)          # ReLU (VPU)
    elif act_type == 2:
        return jnp.tanh(h)                  # Tanh (EUP)
    elif act_type == 3:
        return jax.nn.sigmoid(h)            # Sigmoid (EUP)
    return h                                # no activation (matches the module)


def _make_mlp_kernel(num_hidden, act_type, compute_dtype):
    """Fused MLP kernel: (x_ref, w0, b0, ..., w_fc, b_fc, out_ref).

    Matmuls run on the MXU with `compute_dtype` inputs (bf16 by default) and
    f32 accumulation; bias-add + activation run in f32 on the VPU/EUP.  All
    intermediate activations stay in VMEM (never round-trip to HBM).
    """

    def kernel(x_ref, *refs):
        out_ref = refs[-1]
        params = refs[:-1]

        # x arrives f32 from HBM; cast on-chip (saves a full wrapper HBM pass).
        h = x_ref[...].astype(compute_dtype)

        for i in range(num_hidden):
            w = params[2 * i][...]                       # (in_i, out_i_pad)  compute dtype
            b = params[2 * i + 1][...]                   # (1, out_i_pad)     f32
            h = jnp.dot(h, w, preferred_element_type=jnp.float32) + b
            h = _apply_act(h, act_type).astype(compute_dtype)

        # final fc (no activation); columns already zero-padded to 128 lanes
        y = jnp.dot(h, params[-2][...], preferred_element_type=jnp.float32)
        y = y + params[-1][...]
        out_ref[...] = y.astype(out_ref.dtype)

    return kernel


def _pick_block_m(batch: int, max_width: int) -> int:
    if batch <= 128:
        # whole batch; round to 16 for bf16 sublane packing (harmless for f32)
        return _round_up(max(batch, 16), 16)
    if batch <= 256:
        # >= 2 grid steps so both v7x TensorCores get work
        return 128
    # Large batches: amortize the ~0.35us per-grid-step pipeline overhead.
    if batch >= 1024 and max_width <= 512:
        return 1024
    return 512


def init_params(units, key):
    """Deterministic init. Returns flat list [W0,b0,W1,b1,...,Wfc,bfc].

    W_i has shape (units[i], units[i+1]) (torch weight transposed), so
    y = x @ W + b matches torch's x @ W.T + b.  Biases are (1, out).
    """
    params = []
    keys = jax.random.split(key, len(units) - 1)
    for i in range(len(units) - 1):
        fan_in, fan_out = units[i], units[i + 1]
        kw, kb = jax.random.split(keys[i])
        bound = 1.0 / jnp.sqrt(jnp.float32(fan_in))
        w = jax.random.uniform(kw, (fan_in, fan_out), jnp.float32, -bound, bound)
        b = jax.random.uniform(kb, (1, fan_out), jnp.float32, -bound, bound)
        params += [w, b]
    return params


def prepare_params(params, units, *, compute_dtype=jnp.bfloat16, pad_hidden=True):
    """One-time parameter preparation (hoisted out of the per-call hot path).

    Casts weights to `compute_dtype`, keeps biases f32, and zero-pads all
    hidden/output widths to multiples of 128 lanes (rows of the *next* layer's
    weight are padded with zeros, so padded lanes contribute exactly 0 even
    with sigmoid/tanh).  Returns a flat tuple [W0,b0,...,Wfc,bfc].
    """
    n_layers = len(units) - 1
    padded = [int(units[0])]
    for i in range(1, len(units)):
        is_last = (i == len(units) - 1)
        if pad_hidden or is_last:
            padded.append(_round_up(int(units[i]), 128))
        else:
            padded.append(int(units[i]))

    out = []
    for layer in range(n_layers):
        w = params[2 * layer].astype(compute_dtype)           # (units[l], units[l+1])
        b = params[2 * layer + 1].reshape(1, -1).astype(jnp.float32)
        in_p, out_p = padded[layer], padded[layer + 1]
        w = jnp.pad(w, ((0, in_p - w.shape[0]), (0, out_p - w.shape[1])))
        b = jnp.pad(b, ((0, 0), (0, out_p - b.shape[1])))
        out += [w, b]
    return tuple(out)


@functools.partial(
    jax.jit,
    static_argnames=("units", "act_type", "block_m", "param_buffer_count"),
)
def _net_forward(x, pparams, *, units, act_type, block_m, param_buffer_count):
    batch, in_dim = x.shape
    assert in_dim == units[0]
    num_hidden = len(units) - 2
    out_dim = units[-1]

    out_p = int(pparams[-1].shape[-1])           # padded fc width (multiple of 128)
    compute_dtype = pparams[0].dtype
    out_dtype = x.dtype

    widths = [in_dim] + [int(p.shape[-1]) for p in pparams[::2]]
    max_width = max(widths)

    if block_m is None:
        block_m = _pick_block_m(batch, max_width)
    grid = (pl.cdiv(batch, block_m),)            # ragged last tile: OOB writes discarded

    # ---- BlockSpecs ---------------------------------------------------------
    x_spec = pl.BlockSpec((block_m, in_dim), lambda i: (i, 0))
    pmode = None if param_buffer_count is None else pl.Buffered(param_buffer_count)
    param_specs = []
    for p in pparams:
        shape = tuple(int(s) for s in p.shape)
        if pmode is None:
            param_specs.append(pl.BlockSpec(shape, lambda i: (0, 0)))
        else:
            # grid-invariant blocks: single-buffered -> half the resident VMEM
            param_specs.append(pl.BlockSpec(shape, lambda i: (0, 0), pipeline_mode=pmode))
    out_spec = pl.BlockSpec((block_m, out_p), lambda i: (i, 0))

    # ---- scheduling hints ---------------------------------------------------
    total_m = grid[0] * block_m
    flops = 2 * total_m * sum(widths[i] * widths[i + 1] for i in range(len(widths) - 1))
    transcendentals = total_m * sum(widths[1:-1]) if act_type in (2, 3) else 0
    param_bytes = sum(int(p.size) * p.dtype.itemsize for p in pparams)
    bytes_accessed = (int(x.size) * x.dtype.itemsize + param_bytes
                      + batch * out_p * jnp.dtype(out_dtype).itemsize)
    cost = pl.CostEstimate(flops=int(flops),
                           transcendentals=int(transcendentals),
                           bytes_accessed=int(bytes_accessed))

    # VMEM budget: resident params (x1 when single-buffered) + double-buffered
    # x/out tiles + a few activation-width f32 temporaries.  Cap at ~0.75x of
    # the physical per-core VMEM (v7x: ~48 MiB; v5e/v6e: ~96 MiB).
    pbuf = 2 if param_buffer_count is None else max(1, int(param_buffer_count))
    vmem_est = (pbuf * param_bytes
                + 2 * block_m * in_dim * x.dtype.itemsize
                + 2 * block_m * out_p * jnp.dtype(out_dtype).itemsize
                + 4 * block_m * max_width * 4)
    vmem_limit = None
    if vmem_est > 24 * 1024 * 1024:
        try:
            cap = int(pltpu.get_tpu_info().vmem_capacity_bytes) * 3 // 4
        except Exception:
            cap = 48 * 1024 * 1024
        vmem_limit = min(int(vmem_est * 5 // 4), cap)

    kernel = _make_mlp_kernel(num_hidden, act_type, compute_dtype)

    out_padded = pl.pallas_call(
        kernel,
        out_shape=jax.ShapeDtypeStruct((batch, out_p), out_dtype),
        grid_spec=pltpu.PrefetchScalarGridSpec(
            num_scalar_prefetch=0,
            grid=grid,
            in_specs=[x_spec] + param_specs,
            out_specs=out_spec,
        ),
        compiler_params=pltpu.CompilerParams(
            dimension_semantics=("parallel",),
            vmem_limit_bytes=vmem_limit,
        ),
        cost_estimate=cost,
    )(x, *pparams)

    if out_p != out_dim:
        return out_padded[:, :out_dim]
    return out_padded


def net_forward(x, prepared_params, *, units, act_type=1, block_m=None,
                param_buffer_count=1):
    """Fused MLP forward via a single Pallas kernel, tiled over the batch."""
    units = tuple(int(u) for u in units)
    prepared_params = tuple(prepared_params)
    try:
        return _net_forward(x, prepared_params, units=units, act_type=act_type,
                            block_m=block_m, param_buffer_count=param_buffer_count)
    except Exception:
        if param_buffer_count is None:
            raise
        # Fallback for jax versions that reject single-buffered pipeline_mode.
        return _net_forward(x, prepared_params, units=units, act_type=act_type,
                            block_m=block_m, param_buffer_count=None)


def net_forward_ref(x, params, *, units, act_type=1, compute_dtype=jnp.float32):
    """Pure-JAX reference mirroring the PyTorch forward (optionally with the
    same bf16-in / f32-accumulate numerics as the kernel)."""
    num_hidden = len(units) - 2
    h = x.astype(compute_dtype)
    for i in range(num_hidden):
        w = params[2 * i].astype(compute_dtype)
        b = params[2 * i + 1].reshape(1, -1).astype(jnp.float32)
        h = jnp.dot(h, w, preferred_element_type=jnp.float32) + b
        h = _apply_act(h, act_type).astype(compute_dtype)
    w = params[-2].astype(compute_dtype)
    b = params[-1].reshape(1, -1).astype(jnp.float32)
    return jnp.dot(h, w, preferred_element_type=jnp.float32) + b


if __name__ == "__main__":
    # Small shapes consistent with the module: units = [in, h1, h2, out],
    # ReLU hidden activations (act_type=1).
    units = (16, 32, 64, 8)
    act_type = 1
    batch = 16

    key = jax.random.PRNGKey(0)
    k_x, k_p = jax.random.split(key)
    x = jax.random.normal(k_x, (batch, units[0]), jnp.float32)
    params = init_params(units, k_p)

    # 1) Performance path: one-time prep (bf16 weights, 128-lane-padded widths).
    pparams_bf16 = prepare_params(params, units)
    out_bf16 = jax.block_until_ready(
        net_forward(x, pparams_bf16, units=units, act_type=act_type))
    assert out_bf16.shape == (batch, units[-1])
    ref_bf16 = net_forward_ref(x, params, units=units, act_type=act_type,
                               compute_dtype=jnp.bfloat16)
    assert jnp.allclose(out_bf16, ref_bf16, atol=1e-3, rtol=1e-3), \
        "mismatch vs bf16-matched reference"

    # 2) Exact-semantics path: full f32 compute, matches the PyTorch forward.
    pparams_f32 = prepare_params(params, units, compute_dtype=jnp.float32)
    out_f32 = jax.block_until_ready(
        net_forward(x, pparams_f32, units=units, act_type=act_type))
    ref_f32 = net_forward_ref(x, params, units=units, act_type=act_type,
                              compute_dtype=jnp.float32)
    assert jnp.allclose(out_f32, ref_f32, atol=1e-4, rtol=1e-4), \
        "mismatch vs f32 reference"

    # 3) Sanity: the bf16 path stays close to the exact f32 semantics.
    assert jnp.allclose(out_bf16, ref_f32, atol=5e-2, rtol=5e-2), \
        "bf16 path drifted too far from f32 semantics"

    print("KERNEL_OK")
</pallas_src>

<mosaic_0001>
module attributes {stable_mosaic.version = 11 : i64} {
  func.func @kernel(%arg0: i32, %arg1: memref<16x16xf32, #tpu.memory_space<vmem>>, %arg2: memref<16x128xbf16, #tpu.memory_space<vmem>>, %arg3: memref<1x128xf32, #tpu.memory_space<vmem>>, %arg4: memref<128x128xbf16, #tpu.memory_space<vmem>>, %arg5: memref<1x128xf32, #tpu.memory_space<vmem>>, %arg6: memref<128x128xbf16, #tpu.memory_space<vmem>>, %arg7: memref<1x128xf32, #tpu.memory_space<vmem>>, %arg8: memref<16x128xf32, #tpu.memory_space<vmem>>) attributes {dimension_semantics = [#tpu.dimension_semantics<parallel>], iteration_bounds = array<i64: 1>, scalar_prefetch = 0 : i64, scratch_operands = 0 : i64, tpu.core_type = #tpu.core_type<tc>, window_params = [{transform_indices = @transform_0, window_bounds = array<i64: 16, 16>}, {pipeline_mode = #tpu.pipeline_mode<synchronous>, transform_indices = @transform_1, window_bounds = array<i64: 16, 128>}, {pipeline_mode = #tpu.pipeline_mode<synchronous>, transform_indices = @transform_2, window_bounds = array<i64: 1, 128>}, {pipeline_mode = #tpu.pipeline_mode<synchronous>, transform_indices = @transform_3, window_bounds = array<i64: 128, 128>}, {pipeline_mode = #tpu.pipeline_mode<synchronous>, transform_indices = @transform_4, window_bounds = array<i64: 1, 128>}, {pipeline_mode = #tpu.pipeline_mode<synchronous>, transform_indices = @transform_5, window_bounds = array<i64: 128, 128>}, {pipeline_mode = #tpu.pipeline_mode<synchronous>, transform_indices = @transform_6, window_bounds = array<i64: 1, 128>}, {transform_indices = @transform_7, window_bounds = array<i64: 16, 128>}]} {
    %c0 = arith.constant 0 : index
    %c0_0 = arith.constant 0 : index
    %0 = vector.load %arg1[%c0, %c0_0] : memref<16x16xf32, #tpu.memory_space<vmem>>, vector<16x16xf32>
    %1 = arith.truncf %0 : vector<16x16xf32> to vector<16x16xbf16>
    %c0_1 = arith.constant 0 : index
    %c0_2 = arith.constant 0 : index
    %2 = vector.load %arg2[%c0_1, %c0_2] : memref<16x128xbf16, #tpu.memory_space<vmem>>, vector<16x128xbf16>
    %c0_3 = arith.constant 0 : index
    %c0_4 = arith.constant 0 : index
    %3 = vector.load %arg3[%c0_3, %c0_4] : memref<1x128xf32, #tpu.memory_space<vmem>>, vector<1x128xf32>
    %cst = arith.constant dense<0.000000e+00> : vector<16x128xf32>
    %4 = tpu.matmul %1, %2, %cst {dimension_numbers = #tpu.dot_dimension_numbers<[1], [0], [0], [1], [0, 0, 1, 1], [], []>} : vector<16x16xbf16>, vector<16x128xbf16>, vector<16x128xf32> -> vector<16x128xf32>
    %5 = vector.broadcast %3 : vector<1x128xf32> to vector<16x128xf32>
    %6 = arith.addf %4, %5 : vector<16x128xf32>
    %cst_5 = arith.constant 0.000000e+00 : f32
    %7 = vector.broadcast %cst_5 : f32 to vector<16x128xf32>
    %8 = arith.maximumf %6, %7 : vector<16x128xf32>
    %9 = arith.truncf %8 : vector<16x128xf32> to vector<16x128xbf16>
    %c0_6 = arith.constant 0 : index
    %c0_7 = arith.constant 0 : index
    %10 = vector.load %arg4[%c0_6, %c0_7] : memref<128x128xbf16, #tpu.memory_space<vmem>>, vector<128x128xbf16>
    %c0_8 = arith.constant 0 : index
    %c0_9 = arith.constant 0 : index
    %11 = vector.load %arg5[%c0_8, %c0_9] : memref<1x128xf32, #tpu.memory_space<vmem>>, vector<1x128xf32>
    %cst_10 = arith.constant dense<0.000000e+00> : vector<16x128xf32>
    %12 = tpu.matmul %9, %10, %cst_10 {dimension_numbers = #tpu.dot_dimension_numbers<[1], [0], [0], [1], [0, 0, 1, 1], [], []>} : vector<16x128xbf16>, vector<128x128xbf16>, vector<16x128xf32> -> vector<16x128xf32>
    %13 = vector.broadcast %11 : vector<1x128xf32> to vector<16x128xf32>
    %14 = arith.addf %12, %13 : vector<16x128xf32>
    %cst_11 = arith.constant 0.000000e+00 : f32
    %15 = vector.broadcast %cst_11 : f32 to vector<16x128xf32>
    %16 = arith.maximumf %14, %15 : vector<16x128xf32>
    %17 = arith.truncf %16 : vector<16x128xf32> to vector<16x128xbf16>
    %c0_12 = arith.constant 0 : index
    %c0_13 = arith.constant 0 : index
    %18 = vector.load %arg6[%c0_12, %c0_13] : memref<128x128xbf16, #tpu.memory_space<vmem>>, vector<128x128xbf16>
    %cst_14 = arith.constant dense<0.000000e+00> : vector<16x128xf32>
    %19 = tpu.matmul %17, %18, %cst_14 {dimension_numbers = #tpu.dot_dimension_numbers<[1], [0], [0], [1], [0, 0, 1, 1], [], []>} : vector<16x128xbf16>, vector<128x128xbf16>, vector<16x128xf32> -> vector<16x128xf32>
    %c0_15 = arith.constant 0 : index
    %c0_16 = arith.constant 0 : index
    %20 = vector.load %arg7[%c0_15, %c0_16] : memref<1x128xf32, #tpu.memory_space<vmem>>, vector<1x128xf32>
    %21 = vector.broadcast %20 : vector<1x128xf32> to vector<16x128xf32>
    %22 = arith.addf %19, %21 : vector<16x128xf32>
    %c0_17 = arith.constant 0 : index
    %c0_18 = arith.constant 0 : index
    %23 = vector.load %arg8[%c0_17, %c0_18] : memref<16x128xf32, #tpu.memory_space<vmem>>, vector<16x128xf32>
    tpu.vector_store %arg8[%c0_17, %c0_18], %22 {strides = array<i32>} : memref<16x128xf32, #tpu.memory_space<vmem>>, vector<16x128xf32>,
    return
  }
  func.func @transform_0(%arg0: i32) -> (i32, i32) {
    %c0_i32 = arith.constant 0 : i32
    %c0_i32_0 = arith.constant 0 : i32
    return %arg0, %c0_i32 : i32, i32
  }
  func.func @transform_1(%arg0: i32) -> (i32, i32) {
    %c0_i32 = arith.constant 0 : i32
    %c0_i32_0 = arith.constant 0 : i32
    %c0_i32_1 = arith.constant 0 : i32
    return %c0_i32, %c0_i32_0 : i32, i32
  }
  func.func @transform_2(%arg0: i32) -> (i32, i32) {
    %c0_i32 = arith.constant 0 : i32
    %c0_i32_0 = arith.constant 0 : i32
    %c0_i32_1 = arith.constant 0 : i32
    return %c0_i32, %c0_i32_0 : i32, i32
  }
  func.func @transform_3(%arg0: i32) -> (i32, i32) {
    %c0_i32 = arith.constant 0 : i32
    %c0_i32_0 = arith.constant 0 : i32
    %c0_i32_1 = arith.constant 0 : i32
    return %c0_i32, %c0_i32_0 : i32, i32
  }
  func.func @transform_4(%arg0: i32) -> (i32, i32) {
    %c0_i32 = arith.constant 0 : i32
    %c0_i32_0 = arith.constant 0 : i32
    %c0_i32_1 = arith.constant 0 : i32
    return %c0_i32, %c0_i32_0 : i32, i32
  }
  func.func @transform_5(%arg0: i32) -> (i32, i32) {
    %c0_i32 = arith.constant 0 : i32
    %c0_i32_0 = arith.constant 0 : i32
    %c0_i32_1 = arith.constant 0 : i32
    return %c0_i32, %c0_i32_0 : i32, i32
  }
  func.func @transform_6(%arg0: i32) -> (i32, i32) {
    %c0_i32 = arith.constant 0 : i32
    %c0_i32_0 = arith.constant 0 : i32
    %c0_i32_1 = arith.constant 0 : i32
    return %c0_i32, %c0_i32_0 : i32, i32
  }
  func.func @transform_7(%arg0: i32) -> (i32, i32) {
    %c0_i32 = arith.constant 0 : i32
    %c0_i32_0 = arith.constant 0 : i32
    return %arg0, %c0_i32 : i32, i32
  }
}

module attributes {stable_mosaic.version = 11 : i64} {
  func.func @kernel(%arg0: i32, %arg1: memref<16x16xf32, #tpu.memory_space<vmem>>, %arg2: memref<16x128xbf16, #tpu.memory_space<vmem>>, %arg3: memref<1x128xf32, #tpu.memory_space<vmem>>, %arg4: memref<128x128xbf16, #tpu.memory_space<vmem>>, %arg5: memref<1x128xf32, #tpu.memory_space<vmem>>, %arg6: memref<128x128xbf16, #tpu.memory_space<vmem>>, %arg7: memref<1x128xf32, #tpu.memory_space<vmem>>, %arg8: memref<16x128xf32, #tpu.memory_space<vmem>>) attributes {dimension_semantics = [#tpu.dimension_semantics<parallel>], iteration_bounds = array<i64: 1>, scalar_prefetch = 0 : i64, scratch_operands = 0 : i64, tpu.core_type = #tpu.core_type<tc>, window_params = [{transform_indices = @transform_0, window_bounds = array<i64: 16, 16>}, {pipeline_mode = #tpu.pipeline_mode<synchronous>, transform_indices = @transform_1, window_bounds = array<i64: 16, 128>}, {pipeline_mode = #tpu.pipeline_mode<synchronous>, transform_indices = @transform_2, window_bounds = array<i64: 1, 128>}, {pipeline_mode = #tpu.pipeline_mode<synchronous>, transform_indices = @transform_3, window_bounds = array<i64: 128, 128>}, {pipeline_mode = #tpu.pipeline_mode<synchronous>, transform_indices = @transform_4, window_bounds = array<i64: 1, 128>}, {pipeline_mode = #tpu.pipeline_mode<synchronous>, transform_indices = @transform_5, window_bounds = array<i64: 128, 128>}, {pipeline_mode = #tpu.pipeline_mode<synchronous>, transform_indices = @transform_6, window_bounds = array<i64: 1, 128>}, {transform_indices = @transform_7, window_bounds = array<i64: 16, 128>}]} {
    %c0 = arith.constant 0 : index
    %c0_0 = arith.constant 0 : index
    %0 = vector.load %arg1[%c0, %c0_0] : memref<16x16xf32, #tpu.memory_space<vmem>>, vector<16x16xf32>
    %1 = arith.truncf %0 : vector<16x16xf32> to vector<16x16xbf16>
    %c0_1 = arith.constant 0 : index
    %c0_2 = arith.constant 0 : index
    %2 = vector.load %arg2[%c0_1, %c0_2] : memref<16x128xbf16, #tpu.memory_space<vmem>>, vector<16x128xbf16>
    %c0_3 = arith.constant 0 : index
    %c0_4 = arith.constant 0 : index
    %3 = vector.load %arg3[%c0_3, %c0_4] : memref<1x128xf32, #tpu.memory_space<vmem>>, vector<1x128xf32>
    %cst = arith.constant dense<0.000000e+00> : vector<16x128xf32>
    %4 = tpu.matmul %1, %2, %cst {dimension_numbers = #tpu.dot_dimension_numbers<[1], [0], [0], [1], [0, 0, 1, 1], [], []>} : vector<16x16xbf16>, vector<16x128xbf16>, vector<16x128xf32> -> vector<16x128xf32>
    %5 = vector.broadcast %3 : vector<1x128xf32> to vector<16x128xf32>
    %6 = arith.addf %4, %5 : vector<16x128xf32>
    %cst_5 = arith.constant 0.000000e+00 : f32
    %7 = vector.broadcast %cst_5 : f32 to vector<16x128xf32>
    %8 = arith.maximumf %6, %7 : vector<16x128xf32>
    %9 = arith.truncf %8 : vector<16x128xf32> to vector<16x128xbf16>
    %c0_6 = arith.constant 0 : index
    %c0_7 = arith.constant 0 : index
    %10 = vector.load %arg4[%c0_6, %c0_7] : memref<128x128xbf16, #tpu.memory_space<vmem>>, vector<128x128xbf16>
    %c0_8 = arith.constant 0 : index
    %c0_9 = arith.constant 0 : index
    %11 = vector.load %arg5[%c0_8, %c0_9] : memref<1x128xf32, #tpu.memory_space<vmem>>, vector<1x128xf32>
    %cst_10 = arith.constant dense<0.000000e+00> : vector<16x128xf32>
    %12 = tpu.matmul %9, %10, %cst_10 {dimension_numbers = #tpu.dot_dimension_numbers<[1], [0], [0], [1], [0, 0, 1, 1], [], []>} : vector<16x128xbf16>, vector<128x128xbf16>, vector<16x128xf32> -> vector<16x128xf32>
    %13 = vector.broadcast %11 : vector<1x128xf32> to vector<16x128xf32>
    %14 = arith.addf %12, %13 : vector<16x128xf32>
    %cst_11 = arith.constant 0.000000e+00 : f32
    %15 = vector.broadcast %cst_11 : f32 to vector<16x128xf32>
    %16 = arith.maximumf %14, %15 : vector<16x128xf32>
    %17 = arith.truncf %16 : vector<16x128xf32> to vector<16x128xbf16>
    %c0_12 = arith.constant 0 : index
    %c0_13 = arith.constant 0 : index
    %18 = vector.load %arg6[%c0_12, %c0_13] : memref<128x128xbf16, #tpu.memory_space<vmem>>, vector<128x128xbf16>
    %cst_14 = arith.constant dense<0.000000e+00> : vector<16x128xf32>
    %19 = tpu.matmul %17, %18, %cst_14 {dimension_numbers = #tpu.dot_dimension_numbers<[1], [0], [0], [1], [0, 0, 1, 1], [], []>} : vector<16x128xbf16>, vector<128x128xbf16>, vector<16x128xf32> -> vector<16x128xf32>
    %c0_15 = arith.constant 0 : index
    %c0_16 = arith.constant 0 : index
    %20 = vector.load %arg7[%c0_15, %c0_16] : memref<1x128xf32, #tpu.memory_space<vmem>>, vector<1x128xf32>
    %21 = vector.broadcast %20 : vector<1x128xf32> to vector<16x128xf32>
    %22 = arith.addf %19, %21 : vector<16x128xf32>
    %c0_17 = arith.constant 0 : index
    %c0_18 = arith.constant 0 : index
    %23 = vector.load %arg8[%c0_17, %c0_18] : memref<16x128xf32, #tpu.memory_space<vmem>>, vector<16x128xf32>
    tpu.vector_store %arg8[%c0_17, %c0_18], %22 {strides = array<i32>} : memref<16x128xf32, #tpu.memory_space<vmem>>, vector<16x128xf32>,
    return
  }
  func.func @transform_0(%arg0: i32) -> (i32, i32) {
    %c0_i32 = arith.constant 0 : i32
    %c0_i32_0 = arith.constant 0 : i32
    return %arg0, %c0_i32 : i32, i32
  }
  func.func @transform_1(%arg0: i32) -> (i32, i32) {
    %c0_i32 = arith.constant 0 : i32
    %c0_i32_0 = arith.constant 0 : i32
    %c0_i32_1 = arith.constant 0 : i32
    return %c0_i32, %c0_i32_0 : i32, i32
  }
  func.func @transform_2(%arg0: i32) -> (i32, i32) {
    %c0_i32 = arith.constant 0 : i32
    %c0_i32_0 = arith.constant 0 : i32
    %c0_i32_1 = arith.constant 0 : i32
    return %c0_i32, %c0_i32_0 : i32, i32
  }
  func.func @transform_3(%arg0: i32) -> (i32, i32) {
    %c0_i32 = arith.constant 0 : i32
    %c0_i32_0 = arith.constant 0 : i32
    %c0_i32_1 = arith.constant 0 : i32
    return %c0_i32, %c0_i32_0 : i32, i32
  }
  func.func @transform_4(%arg0: i32) -> (i32, i32) {
    %c0_i32 = arith.constant 0 : i32
    %c0_i32_0 = arith.constant 0 : i32
    %c0_i32_1 = arith.constant 0 : i32
    return %c0_i32, %c0_i32_0 : i32, i32
  }
  func.func @transform_5(%arg0: i32) -> (i32, i32) {
    %c0_i32 = arith.constant 0 : i32
    %c0_i32_0 = arith.constant 0 : i32
    %c0_i32_1 = arith.constant 0 : i32
    return %c0_i32, %c0_i32_0 : i32, i32
  }
  func.func @transform_6(%arg0: i32) -> (i32, i32) {
    %c0_i32 = arith.constant 0 : i32
    %c0_i32_0 = arith.constant 0 : i32
    %c0_i32_1 = arith.constant 0 : i32
    return %c0_i32, %c0_i32_0 : i32, i32
  }
  func.func @transform_7(%arg0: i32) -> (i32, i32) {
    %c0_i32 = arith.constant 0 : i32
    %c0_i32_0 = arith.constant 0 : i32
    return %arg0, %c0_i32 : i32, i32
  }
}

</mosaic_0001>

<bundles_post_ra>
// kernel: _net_forward.1
= control target key start
LH: loop header
LB: loop body
LE: loop exit
PB: predicated region body
PF: predicated region fallthrough
CT: control target
= control target key end

     0   :  { %12 = vsyncpa [#allocation3], 0  ;;  %s744_s0 = inlined_call_operand.hbm [shape: f32[16,16], index: 0, kind: input, shape index: {}]   ;;  %s745_s1 = inlined_call_operand.hbm [shape: bf16[16,128], index: 1, kind: input, shape index: {}]   ;;  %s746_s2 = inlined_call_operand.vmem [shape: f32[1,128], index: 2, kind: input, shape index: {}]   ;;  %s747_s3 = inlined_call_operand.hbm [shape: bf16[128,128], index: 3, kind: input, shape index: {}]   ;;  %s748_s4 = inlined_call_operand.vmem [shape: f32[1,128], index: 4, kind: input, shape index: {}]   ;;  %s749_s5 = inlined_call_operand.hbm [shape: bf16[128,128], index: 5, kind: input, shape index: {}]   ;;  %s750_s6 = inlined_call_operand.vmem [shape: f32[1,128], index: 6, kind: input, shape index: {}]   ;;  %s751_s7 = inlined_call_operand.vmem [shape: f32[16,128], index: 7, kind: output, shape index: {}]  }
   0x1   :  { %13 = vsyncpa [#allocation5], 0 }
   0x2   :  { %14 = vsyncpa [#allocation8], 0  ;;  %s592_s24 = smov [#allocation4]   ;;  %s498_s28 = scalar_lea.hbm %s745_s1, 128 }
   0x3   :  { %s32_s25 = sshll.u32 %s592_s24, 4  ;;  %p499_p0 = scmp.ne.s32.totalorder %s745_s1, %s498_s28  ;;  %s33_s25 = int_to_ptr.vmem [resolvable:$true] %s32_s25 }
   0x4   :  { %p502_p1 = scmp.lt.u32.totalorder %s498_s28, %s745_s1 }
   0x6   :  { %p504_p2 = pnand %p502_p1, %p499_p0 }
   0x8   :  { %507 = shalt.err (!%p504_p2)
}
   0x9   :  { %s508_s10 = scalar_lea.vmem %s33_s25, 128  ;;  %p513_p4 = scmp.lt.s32.totalorder %s33_s25, %s33_s25 }
   0xa   :  { %p509_p3 = scmp.ne.s32.totalorder %s33_s25, %s508_s10  ;;  %p514_p5 = scmp.lt.s32.totalorder %s508_s10, %s508_s10 }
   0xc   :  { %p515_p6 = por %p514_p5, %p513_p4 }
   0xe   :  { %p516_p7 = pnand %p515_p6, %p509_p3 }
  0x10   :  { %519 = shalt.err (!%p516_p7)
}
  0x11   :  { %s593_s11 = smov 64   ;;  %s594_s12 = smov 4  }
  0x12   :  { %38 = dma.hbm_to_vmem [thread:$0]  %s745_s1, 128, %s33_s25, [#allocation5], %s593_s11, %s593_s11, %s594_s12  }
  0x13   :  { %s595_s15 = smov [#allocation2]   ;;  %s520_s19 = scalar_lea.hbm %s744_s0, 256 }
  0x14   :  { %s20_s16 = sshll.u32 %s595_s15, 4  ;;  %p521_p8 = scmp.ne.s32.totalorder %s744_s0, %s520_s19  ;;  %s21_s16 = int_to_ptr.vmem [resolvable:$true] %s20_s16 }
  0x15   :  { %p524_p9 = scmp.lt.u32.totalorder %s520_s19, %s744_s0 }
  0x17   :  { %p526_p10 = pnand %p524_p9, %p521_p8 }
  0x19   :  { %529 = shalt.err (!%p526_p10)
}
  0x1a   :  { %s530_s24 = scalar_lea.vmem %s21_s16, 256  ;;  %p535_p12 = scmp.lt.s32.totalorder %s21_s16, %s21_s16 }
  0x1b   :  { %p531_p11 = scmp.ne.s32.totalorder %s21_s16, %s530_s24  ;;  %p536_p13 = scmp.lt.s32.totalorder %s530_s24, %s530_s24 }
  0x1d   :  { %p537_p0 = por %p536_p13, %p535_p12 }
  0x1f   :  { %p538_p1 = pnand %p537_p0, %p531_p11 }
  0x21   :  { %541 = shalt.err (!%p538_p1)
}
  0x22   :  { %s596_s1 = smov 128   ;;  %s597_s25 = smov 8  }
  0x23   :  { %26 = dma.hbm_to_vmem [thread:$0]  %s744_s0, 256, %s21_s16, [#allocation3], %s596_s1, %s596_s1, %s597_s25  }
  0x24   :  { %s598_s28 = smov [#allocation6]   ;;  %s599_s30 = smov [#allocation7]  }
  0x25   :  { %s46_s29 = sshll.u32 %s598_s28, 4  ;;  %s60_s8 = sshll.u32 %s599_s30, 4  ;;  %s47_s29 = int_to_ptr.vmem [resolvable:$true] %s46_s29  ;;  %s669_s8 = int_to_ptr.vmem [resolvable:$true] %s60_s8 }
  0x26   :  { %s542_s13 = scalar_lea.hbm %s747_s3, 1024 }
  0x27   :  { %p543_p2 = scmp.ne.s32.totalorder %s747_s3, %s542_s13  ;;  %p546_p3 = scmp.lt.u32.totalorder %s542_s13, %s747_s3 }
  0x29   :  { %p548_p4 = pnand %p546_p3, %p543_p2 }
  0x2b   :  { %551 = shalt.err (!%p548_p4)
}
  0x2c   :  { %s552_s0 = scalar_lea.vmem %s47_s29, 1024  ;;  %p557_p6 = scmp.lt.s32.totalorder %s47_s29, %s47_s29 }
  0x2d   :  { %p553_p5 = scmp.ne.s32.totalorder %s47_s29, %s552_s0  ;;  %p558_p7 = scmp.lt.s32.totalorder %s552_s0, %s552_s0 }
  0x2f   :  { %p559_p8 = por %p558_p7, %p557_p6 }
  0x31   :  { %p560_p9 = pnand %p559_p8, %p553_p5 }
  0x33   :  { %563 = shalt.err (!%p560_p9)
}
  0x34   :  { %52 = dma.hbm_to_vmem [thread:$0]  %s747_s3, 1024, %s47_s29, [#allocation5], %s593_s11, %s593_s11, %s594_s12  }
  0x35   :  { %s564_s22 = scalar_lea.hbm %s749_s5, 1024 }
  0x36   :  { %p565_p10 = scmp.ne.s32.totalorder %s749_s5, %s564_s22  ;;  %p568_p11 = scmp.lt.u32.totalorder %s564_s22, %s749_s5 }
  0x38   :  { %p570_p12 = pnand %p568_p11, %p565_p10 }
  0x3a   :  { %573 = shalt.err (!%p570_p12)
}
  0x3b   :  { %s574_s26 = scalar_lea.vmem %s669_s8, 1024  ;;  %p579_p0 = scmp.lt.s32.totalorder %s669_s8, %s669_s8 }
  0x3c   :  { %p575_p13 = scmp.ne.s32.totalorder %s669_s8, %s574_s26  ;;  %p580_p1 = scmp.lt.s32.totalorder %s574_s26, %s574_s26 }
  0x3e   :  { %p581_p2 = por %p580_p1, %p579_p0 }
  0x40   :  { %p582_p3 = pnand %p581_p2, %p575_p13 }
  0x42   :  { %585 = shalt.err (!%p582_p3)
}
  0x43   :  { %66 = dma.hbm_to_vmem [thread:$0]  %s749_s5, 1024, %s669_s8, [#allocation8], %s593_s11, %s593_s11, %s594_s12  }
  0x44   :  { %586 = dma.done.wait [#allocation3], 256  }
  0x45   :  { %587 = vsyncadd [#allocation3], 4294967040 }
  0x46   :  { %588 = dma.done.wait [#allocation5], 1152  }
  0x47   :  { %589 = vsyncadd [#allocation5], 4294966144 }
  0x48   :  { %590 = dma.done.wait [#allocation8], 1024  }
  0x49   :  { %591 = vsyncadd [#allocation8], 4294966272  ;;  %v600_v0 = vmov 0.0   ;;  %vm601_vm0 = vmmov 0   ;;  %v481_v1 = vld [vmem:[#allocation4] sm:$0xff]   ;;  %v82_v2 = vld [vmem:[#allocation2] sm:$0xff] }
  0x4a   :  { %425 = vmatprep.subr.bf16.mxu0 %v600_v0  ;;  %427 = vmatprep.mubr.msk.bf16.mxu0 %vm601_vm0, %v600_v0  ;;  %v83_v3 = vld [vmem:[#allocation2 + $0x8] sm:$0xff]  ;;  %vm100_vm1 = vcmask 130048   ;;  %v482_v5 = vld [vmem:[#allocation6] sm:$0xff]   ;;  %v483_v6 = vld [vmem:[#allocation6 + $0x8] sm:$0xff]  }
  0x4b   :  { %431 = vmatprep.subr.bf16.mxu1 %v600_v0  ;;  %447 = vmatprep.mubr.msk.bf16.mxu1 %vm601_vm0, %v600_v0  ;;  %v84_v4 = vpack.c.bf16 %v83_v3, %v82_v2  ;;  %v484_v7 = vld [vmem:[#allocation6 + $0x10] sm:$0xff]   ;;  %v485_v8 = vld [vmem:[#allocation6 + $0x18] sm:$0xff]   ;;  %v486_v9 = vld [vmem:[#allocation6 + $0x20] sm:$0xff]  }
  0x4c   :  { %426 = vmatpush3.bf16.msra.mxu0 %v481_v1  ;;  %432 = vmatpush3.bf16.msra.mxu1 %v482_v5  ;;  %v487_v10 = vld [vmem:[#allocation6 + $0x28] sm:$0xff]   ;;  %v488_v11 = vld [vmem:[#allocation6 + $0x30] sm:$0xff]   ;;  %v489_v12 = vld [vmem:[#allocation6 + $0x38] sm:$0xff]  }
  0x4d   :  { %451 = vmatprep.subr.bf16.mxu0 %v600_v0  ;;  %433 = vmatprep.subr.bf16.mxu1 %v600_v0  ;;  %v490_v13 = vld [vmem:[#allocation7] sm:$0xff]   ;;  %v491_v14 = vld [vmem:[#allocation7 + $0x8] sm:$0xff]   ;;  %v492_v15 = vld [vmem:[#allocation7 + $0x10] sm:$0xff]  }
  0x4e   :  { %v493_v16 = vld [vmem:[#allocation7 + $0x18] sm:$0xff]   ;;  %v494_v17 = vld [vmem:[#allocation7 + $0x20] sm:$0xff]   ;;  %v495_v18 = vld [vmem:[#allocation7 + $0x28] sm:$0xff]  }
  0x4f   :  { %428 = vmatmul.mubr.msk.bf16.vlgmr.msra.gmra.mrb[0].mxu0 %vm100_vm1, %v84_v4  ;;  %v384_v19 = vld [vmem:[%s746_s2] ss:$0 sm:$0xff]  ;;  %v496_v29 = vld [vmem:[#allocation7 + $0x30] sm:$0xff]   ;;  %v497_v30 = vld [vmem:[#allocation7 + $0x38] sm:$0xff]  }
  0x50   :  { %467 = vmatprep.mubr.msk.bf16.mxu0 %vm601_vm0, %v600_v0  ;;  %434 = vmatpush3.bf16.msra.mxu1 %v483_v6  ;;  %v387_v31 = vld [vmem:[%s748_s4] ss:$0 sm:$0xff] }
  0x51   :  { %435 = vmatprep.subr.bf16.mxu1 %v600_v0  ;;  %452 = vmatpush3.bf16.msra.mxu0 %v490_v13  ;;  %v396_v41 = vld [vmem:[%s750_s6] ss:$0 sm:$0xff] }
  0x52   :  { %453 = vmatprep.subr.bf16.mxu0 %v600_v0 }
  0x54   :  { %436 = vmatpush3.bf16.msra.mxu1 %v484_v7 }
  0x55   :  { %437 = vmatprep.subr.bf16.mxu1 %v600_v0  ;;  %454 = vmatpush3.bf16.msra.mxu0 %v491_v14 }
  0x56   :  { %455 = vmatprep.subr.bf16.mxu0 %v600_v0 }
  0x58   :  { %438 = vmatpush3.bf16.msra.mxu1 %v485_v8 }
  0x59   :  { %439 = vmatprep.subr.bf16.mxu1 %v600_v0  ;;  %456 = vmatpush3.bf16.msra.mxu0 %v492_v15 }
  0x5a   :  { %457 = vmatprep.subr.bf16.mxu0 %v600_v0 }
  0x5c   :  { %440 = vmatpush3.bf16.msra.mxu1 %v486_v9 }
  0x5d   :  { %441 = vmatprep.subr.bf16.mxu1 %v600_v0  ;;  %458 = vmatpush3.bf16.msra.mxu0 %v493_v16 }
  0x5e   :  { %459 = vmatprep.subr.bf16.mxu0 %v600_v0 }
  0x60   :  { %442 = vmatpush3.bf16.msra.mxu1 %v487_v10 }
  0x61   :  { %443 = vmatprep.subr.bf16.mxu1 %v600_v0  ;;  %460 = vmatpush3.bf16.msra.mxu0 %v494_v17 }
  0x62   :  { %461 = vmatprep.subr.bf16.mxu0 %v600_v0 }
  0x64   :  { %444 = vmatpush3.bf16.msra.mxu1 %v488_v11 }
  0x65   :  { %445 = vmatprep.subr.bf16.mxu1 %v600_v0  ;;  %462 = vmatpush3.bf16.msra.mxu0 %v495_v18 }
  0x66   :  { %463 = vmatprep.subr.bf16.mxu0 %v600_v0 }
  0x68   :  { %446 = vmatpush3.bf16.msra.mxu1 %v489_v12 }
  0x69   :  { %464 = vmatpush3.bf16.msra.mxu0 %v496_v29 }
  0x6a   :  { %465 = vmatprep.subr.bf16.mxu0 %v600_v0 }
  0x6d   :  { %466 = vmatpush3.bf16.msra.mxu0 %v497_v30 }
 0x122   :  { %v138_v20 = vpop.f32.mrb[0].mxu0 }
 0x123   :  { %v139_v21 = vadd.f32 %v384_v19, %v138_v20  ;;  %v429_v22 = vpop.f32.mrb[1].mxu0 }
 0x124   :  { %v141_v23 = vpop.f32.mrb[2].mxu0 }
 0x125   :  { %v142_v24 = vadd.f32 %v384_v19, %v141_v23  ;;  %v430_v25 = vpop.f32.mrb[3].mxu0  ;;  %v145_v26 = vmax.f32 %v139_v21, 0.0 }
 0x127   :  { %v146_v27 = vmax.f32 %v142_v24, 0.0 }
 0x129   :  { %v147_v28 = vpack.c.bf16 %v146_v27, %v145_v26 }
 0x12b   :  { %448 = vmatmul.mubr.bf16.vlgmr.msra.gmra.mrb[0].mxu1 %v147_v28 }
 0x1fe   :  { %v253_v32 = vpop.f32.mrb[0].mxu1 }
 0x1ff   :  { %v254_v33 = vadd.f32 %v387_v31, %v253_v32  ;;  %v449_v34 = vpop.f32.mrb[1].mxu1 }
 0x200   :  { %v256_v35 = vpop.f32.mrb[2].mxu1 }
 0x201   :  { %v257_v36 = vadd.f32 %v387_v31, %v256_v35  ;;  %v450_v37 = vpop.f32.mrb[3].mxu1  ;;  %v260_v38 = vmax.f32 %v254_v33, 0.0 }
 0x203   :  { %v261_v39 = vmax.f32 %v257_v36, 0.0 }
 0x205   :  { %v262_v40 = vpack.c.bf16 %v261_v39, %v260_v38 }
 0x207   :  { %468 = vmatmul.mubr.bf16.vlgmr.msra.gmra.mrb[4].mxu0 %v262_v40 }
 0x2da   :  { %v368_v42 = vpop.f32.mrb[4].mxu0 }
 0x2db   :  { %v369_v43 = vadd.f32 %v396_v41, %v368_v42  ;;  %v469_v44 = vpop.f32.mrb[5].mxu0 }
 0x2dc   :  { %v371_v45 = vpop.f32.mrb[6].mxu0 }
 0x2dd   :  { %375 = vst [vmem:[%s751_s7] sm:$0xff] %v369_v43  ;;  %v372_v46 = vadd.f32 %v396_v41, %v371_v45  ;;  %v470_v47 = vpop.f32.mrb[7].mxu0 }
 0x2df   :  { %376 = vst [vmem:[%s751_s7 + $0x8] sm:$0xff] %v372_v46 }
 0x2e0   :  { %381 = vsyncpa [#allocation3], 1 }
 0x2e1   :  { %382 = vsyncpa [#allocation5], 1 }
 0x2e2   :  { %383 = vsyncpa [#allocation8], 1 }

// kernel: _net_forward.1
= control target key start
LH: loop header
LB: loop body
LE: loop exit
PB: predicated region body
PF: predicated region fallthrough
CT: control target
= control target key end

     0   :  { %12 = vsyncpa [#allocation3], 0  ;;  %s744_s0 = inlined_call_operand.hbm [shape: f32[16,16], index: 0, kind: input, shape index: {}]   ;;  %s745_s1 = inlined_call_operand.hbm [shape: bf16[16,128], index: 1, kind: input, shape index: {}]   ;;  %s746_s2 = inlined_call_operand.vmem [shape: f32[1,128], index: 2, kind: input, shape index: {}]   ;;  %s747_s3 = inlined_call_operand.hbm [shape: bf16[128,128], index: 3, kind: input, shape index: {}]   ;;  %s748_s4 = inlined_call_operand.vmem [shape: f32[1,128], index: 4, kind: input, shape index: {}]   ;;  %s749_s5 = inlined_call_operand.hbm [shape: bf16[128,128], index: 5, kind: input, shape index: {}]   ;;  %s750_s6 = inlined_call_operand.vmem [shape: f32[1,128], index: 6, kind: input, shape index: {}]   ;;  %s751_s7 = inlined_call_operand.vmem [shape: f32[16,128], index: 7, kind: output, shape index: {}]  }
   0x1   :  { %13 = vsyncpa [#allocation5], 0 }
   0x2   :  { %14 = vsyncpa [#allocation8], 0  ;;  %s592_s24 = smov [#allocation4]   ;;  %s498_s28 = scalar_lea.hbm %s745_s1, 128 }
   0x3   :  { %s32_s25 = sshll.u32 %s592_s24, 4  ;;  %p499_p0 = scmp.ne.s32.totalorder %s745_s1, %s498_s28  ;;  %s33_s25 = int_to_ptr.vmem [resolvable:$true] %s32_s25 }
   0x4   :  { %p502_p1 = scmp.lt.u32.totalorder %s498_s28, %s745_s1 }
   0x6   :  { %p504_p2 = pnand %p502_p1, %p499_p0 }
   0x8   :  { %507 = shalt.err (!%p504_p2)
}
   0x9   :  { %s508_s10 = scalar_lea.vmem %s33_s25, 128  ;;  %p513_p4 = scmp.lt.s32.totalorder %s33_s25, %s33_s25 }
   0xa   :  { %p509_p3 = scmp.ne.s32.totalorder %s33_s25, %s508_s10  ;;  %p514_p5 = scmp.lt.s32.totalorder %s508_s10, %s508_s10 }
   0xc   :  { %p515_p6 = por %p514_p5, %p513_p4 }
   0xe   :  { %p516_p7 = pnand %p515_p6, %p509_p3 }
  0x10   :  { %519 = shalt.err (!%p516_p7)
}
  0x11   :  { %s593_s11 = smov 64   ;;  %s594_s12 = smov 4  }
  0x12   :  { %38 = dma.hbm_to_vmem [thread:$0]  %s745_s1, 128, %s33_s25, [#allocation5], %s593_s11, %s593_s11, %s594_s12  }
  0x13   :  { %s595_s15 = smov [#allocation2]   ;;  %s520_s19 = scalar_lea.hbm %s744_s0, 256 }
  0x14   :  { %s20_s16 = sshll.u32 %s595_s15, 4  ;;  %p521_p8 = scmp.ne.s32.totalorder %s744_s0, %s520_s19  ;;  %s21_s16 = int_to_ptr.vmem [resolvable:$true] %s20_s16 }
  0x15   :  { %p524_p9 = scmp.lt.u32.totalorder %s520_s19, %s744_s0 }
  0x17   :  { %p526_p10 = pnand %p524_p9, %p521_p8 }
  0x19   :  { %529 = shalt.err (!%p526_p10)
}
  0x1a   :  { %s530_s24 = scalar_lea.vmem %s21_s16, 256  ;;  %p535_p12 = scmp.lt.s32.totalorder %s21_s16, %s21_s16 }
  0x1b   :  { %p531_p11 = scmp.ne.s32.totalorder %s21_s16, %s530_s24  ;;  %p536_p13 = scmp.lt.s32.totalorder %s530_s24, %s530_s24 }
  0x1d   :  { %p537_p0 = por %p536_p13, %p535_p12 }
  0x1f   :  { %p538_p1 = pnand %p537_p0, %p531_p11 }
  0x21   :  { %541 = shalt.err (!%p538_p1)
}
  0x22   :  { %s596_s1 = smov 128   ;;  %s597_s25 = smov 8  }
  0x23   :  { %26 = dma.hbm_to_vmem [thread:$0]  %s744_s0, 256, %s21_s16, [#allocation3], %s596_s1, %s596_s1, %s597_s25  }
  0x24   :  { %s598_s28 = smov [#allocation6]   ;;  %s599_s30 = smov [#allocation7]  }
  0x25   :  { %s46_s29 = sshll.u32 %s598_s28, 4  ;;  %s60_s8 = sshll.u32 %s599_s30, 4  ;;  %s47_s29 = int_to_ptr.vmem [resolvable:$true] %s46_s29  ;;  %s669_s8 = int_to_ptr.vmem [resolvable:$true] %s60_s8 }
  0x26   :  { %s542_s13 = scalar_lea.hbm %s747_s3, 1024 }
  0x27   :  { %p543_p2 = scmp.ne.s32.totalorder %s747_s3, %s542_s13  ;;  %p546_p3 = scmp.lt.u32.totalorder %s542_s13, %s747_s3 }
  0x29   :  { %p548_p4 = pnand %p546_p3, %p543_p2 }
  0x2b   :  { %551 = shalt.err (!%p548_p4)
}
  0x2c   :  { %s552_s0 = scalar_lea.vmem %s47_s29, 1024  ;;  %p557_p6 = scmp.lt.s32.totalorder %s47_s29, %s47_s29 }
  0x2d   :  { %p553_p5 = scmp.ne.s32.totalorder %s47_s29, %s552_s0  ;;  %p558_p7 = scmp.lt.s32.totalorder %s552_s0, %s552_s0 }
  0x2f   :  { %p559_p8 = por %p558_p7, %p557_p6 }
  0x31   :  { %p560_p9 = pnand %p559_p8, %p553_p5 }
  0x33   :  { %563 = shalt.err (!%p560_p9)
}
  0x34   :  { %52 = dma.hbm_to_vmem [thread:$0]  %s747_s3, 1024, %s47_s29, [#allocation5], %s593_s11, %s593_s11, %s594_s12  }
  0x35   :  { %s564_s22 = scalar_lea.hbm %s749_s5, 1024 }
  0x36   :  { %p565_p10 = scmp.ne.s32.totalorder %s749_s5, %s564_s22  ;;  %p568_p11 = scmp.lt.u32.totalorder %s564_s22, %s749_s5 }
  0x38   :  { %p570_p12 = pnand %p568_p11, %p565_p10 }
  0x3a   :  { %573 = shalt.err (!%p570_p12)
}
  0x3b   :  { %s574_s26 = scalar_lea.vmem %s669_s8, 1024  ;;  %p579_p0 = scmp.lt.s32.totalorder %s669_s8, %s669_s8 }
  0x3c   :  { %p575_p13 = scmp.ne.s32.totalorder %s669_s8, %s574_s26  ;;  %p580_p1 = scmp.lt.s32.totalorder %s574_s26, %s574_s26 }
  0x3e   :  { %p581_p2 = por %p580_p1, %p579_p0 }
  0x40   :  { %p582_p3 = pnand %p581_p2, %p575_p13 }
  0x42   :  { %585 = shalt.err (!%p582_p3)
}
  0x43   :  { %66 = dma.hbm_to_vmem [thread:$0]  %s749_s5, 1024, %s669_s8, [#allocation8], %s593_s11, %s593_s11, %s594_s12  }
  0x44   :  { %586 = dma.done.wait [#allocation3], 256  }
  0x45   :  { %587 = vsyncadd [#allocation3], 4294967040 }
  0x46   :  { %588 = dma.done.wait [#allocation5], 1152  }
  0x47   :  { %589 = vsyncadd [#allocation5], 4294966144 }
  0x48   :  { %590 = dma.done.wait [#allocation8], 1024  }
  0x49   :  { %591 = vsyncadd [#allocation8], 4294966272  ;;  %v600_v0 = vmov 0.0   ;;  %vm601_vm0 = vmmov 0   ;;  %v481_v1 = vld [vmem:[#allocation4] sm:$0xff]   ;;  %v82_v2 = vld [vmem:[#allocation2] sm:$0xff] }
  0x4a   :  { %425 = vmatprep.subr.bf16.mxu0 %v600_v0  ;;  %427 = vmatprep.mubr.msk.bf16.mxu0 %vm601_vm0, %v600_v0  ;;  %v83_v3 = vld [vmem:[#allocation2 + $0x8] sm:$0xff]  ;;  %vm100_vm1 = vcmask 130048   ;;  %v482_v5 = vld [vmem:[#allocation6] sm:$0xff]   ;;  %v483_v6 = vld [vmem:[#allocation6 + $0x8] sm:$0xff]  }
  0x4b   :  { %431 = vmatprep.subr.bf16.mxu1 %v600_v0  ;;  %447 = vmatprep.mubr.msk.bf16.mxu1 %vm601_vm0, %v600_v0  ;;  %v84_v4 = vpack.c.bf16 %v83_v3, %v82_v2  ;;  %v484_v7 = vld [vmem:[#allocation6 + $0x10] sm:$0xff]   ;;  %v485_v8 = vld [vmem:[#allocation6 + $0x18] sm:$0xff]   ;;  %v486_v9 = vld [vmem:[#allocation6 + $0x20] sm:$0xff]  }
  0x4c   :  { %426 = vmatpush3.bf16.msra.mxu0 %v481_v1  ;;  %432 = vmatpush3.bf16.msra.mxu1 %v482_v5  ;;  %v487_v10 = vld [vmem:[#allocation6 + $0x28] sm:$0xff]   ;;  %v488_v11 = vld [vmem:[#allocation6 + $0x30] sm:$0xff]   ;;  %v489_v12 = vld [vmem:[#allocation6 + $0x38] sm:$0xff]  }
  0x4d   :  { %451 = vmatprep.subr.bf16.mxu0 %v600_v0  ;;  %433 = vmatprep.subr.bf16.mxu1 %v600_v0  ;;  %v490_v13 = vld [vmem:[#allocation7] sm:$0xff]   ;;  %v491_v14 = vld [vmem:[#allocation7 + $0x8] sm:$0xff]   ;;  %v492_v15 = vld [vmem:[#allocation7 + $0x10] sm:$0xff]  }
  0x4e   :  { %v493_v16 = vld [vmem:[#allocation7 + $0x18] sm:$0xff]   ;;  %v494_v17 = vld [vmem:[#allocation7 + $0x20] sm:$0xff]   ;;  %v495_v18 = vld [vmem:[#allocation7 + $0x28] sm:$0xff]  }
  0x4f   :  { %428 = vmatmul.mubr.msk.bf16.vlgmr.msra.gmra.mrb[0].mxu0 %vm100_vm1, %v84_v4  ;;  %v384_v19 = vld [vmem:[%s746_s2] ss:$0 sm:$0xff]  ;;  %v496_v29 = vld [vmem:[#allocation7 + $0x30] sm:$0xff]   ;;  %v497_v30 = vld [vmem:[#allocation7 + $0x38] sm:$0xff]  }
  0x50   :  { %467 = vmatprep.mubr.msk.bf16.mxu0 %vm601_vm0, %v600_v0  ;;  %434 = vmatpush3.bf16.msra.mxu1 %v483_v6  ;;  %v387_v31 = vld [vmem:[%s748_s4] ss:$0 sm:$0xff] }
  0x51   :  { %435 = vmatprep.subr.bf16.mxu1 %v600_v0  ;;  %452 = vmatpush3.bf16.msra.mxu0 %v490_v13  ;;  %v396_v41 = vld [vmem:[%s750_s6] ss:$0 sm:$0xff] }
  0x52   :  { %453 = vmatprep.subr.bf16.mxu0 %v600_v0 }
  0x54   :  { %436 = vmatpush3.bf16.msra.mxu1 %v484_v7 }
  0x55   :  { %437 = vmatprep.subr.bf16.mxu1 %v600_v0  ;;  %454 = vmatpush3.bf16.msra.mxu0 %v491_v14 }
  0x56   :  { %455 = vmatprep.subr.bf16.mxu0 %v600_v0 }
  0x58   :  { %438 = vmatpush3.bf16.msra.mxu1 %v485_v8 }
  0x59   :  { %439 = vmatprep.subr.bf16.mxu1 %v600_v0  ;;  %456 = vmatpush3.bf16.msra.mxu0 %v492_v15 }
  0x5a   :  { %457 = vmatprep.subr.bf16.mxu0 %v600_v0 }
  0x5c   :  { %440 = vmatpush3.bf16.msra.mxu1 %v486_v9 }
  0x5d   :  { %441 = vmatprep.subr.bf16.mxu1 %v600_v0  ;;  %458 = vmatpush3.bf16.msra.mxu0 %v493_v16 }
  0x5e   :  { %459 = vmatprep.subr.bf16.mxu0 %v600_v0 }
  0x60   :  { %442 = vmatpush3.bf16.msra.mxu1 %v487_v10 }
  0x61   :  { %443 = vmatprep.subr.bf16.mxu1 %v600_v0  ;;  %460 = vmatpush3.bf16.msra.mxu0 %v494_v17 }
  0x62   :  { %461 = vmatprep.subr.bf16.mxu0 %v600_v0 }
  0x64   :  { %444 = vmatpush3.bf16.msra.mxu1 %v488_v11 }
  0x65   :  { %445 = vmatprep.subr.bf16.mxu1 %v600_v0  ;;  %462 = vmatpush3.bf16.msra.mxu0 %v495_v18 }
  0x66   :  { %463 = vmatprep.subr.bf16.mxu0 %v600_v0 }
  0x68   :  { %446 = vmatpush3.bf16.msra.mxu1 %v489_v12 }
  0x69   :  { %464 = vmatpush3.bf16.msra.mxu0 %v496_v29 }
  0x6a   :  { %465 = vmatprep.subr.bf16.mxu0 %v600_v0 }
  0x6d   :  { %466 = vmatpush3.bf16.msra.mxu0 %v497_v30 }
 0x122   :  { %v138_v20 = vpop.f32.mrb[0].mxu0 }
 0x123   :  { %v139_v21 = vadd.f32 %v384_v19, %v138_v20  ;;  %v429_v22 = vpop.f32.mrb[1].mxu0 }
 0x124   :  { %v141_v23 = vpop.f32.mrb[2].mxu0 }
 0x125   :  { %v142_v24 = vadd.f32 %v384_v19, %v141_v23  ;;  %v430_v25 = vpop.f32.mrb[3].mxu0  ;;  %v145_v26 = vmax.f32 %v139_v21, 0.0 }
 0x127   :  { %v146_v27 = vmax.f32 %v142_v24, 0.0 }
 0x129   :  { %v147_v28 = vpack.c.bf16 %v146_v27, %v145_v26 }
 0x12b   :  { %448 = vmatmul.mubr.bf16.vlgmr.msra.gmra.mrb[0].mxu1 %v147_v28 }
 0x1fe   :  { %v253_v32 = vpop.f32.mrb[0].mxu1 }
 0x1ff   :  { %v254_v33 = vadd.f32 %v387_v31, %v253_v32  ;;  %v449_v34 = vpop.f32.mrb[1].mxu1 }
 0x200   :  { %v256_v35 = vpop.f32.mrb[2].mxu1 }
 0x201   :  { %v257_v36 = vadd.f32 %v387_v31, %v256_v35  ;;  %v450_v37 = vpop.f32.mrb[3].mxu1  ;;  %v260_v38 = vmax.f32 %v254_v33, 0.0 }
 0x203   :  { %v261_v39 = vmax.f32 %v257_v36, 0.0 }
 0x205   :  { %v262_v40 = vpack.c.bf16 %v261_v39, %v260_v38 }
 0x207   :  { %468 = vmatmul.mubr.bf16.vlgmr.msra.gmra.mrb[4].mxu0 %v262_v40 }
 0x2da   :  { %v368_v42 = vpop.f32.mrb[4].mxu0 }
 0x2db   :  { %v369_v43 = vadd.f32 %v396_v41, %v368_v42  ;;  %v469_v44 = vpop.f32.mrb[5].mxu0 }
 0x2dc   :  { %v371_v45 = vpop.f32.mrb[6].mxu0 }
 0x2dd   :  { %375 = vst [vmem:[%s751_s7] sm:$0xff] %v369_v43  ;;  %v372_v46 = vadd.f32 %v396_v41, %v371_v45  ;;  %v470_v47 = vpop.f32.mrb[7].mxu0 }
 0x2df   :  { %376 = vst [vmem:[%s751_s7 + $0x8] sm:$0xff] %v372_v46 }
 0x2e0   :  { %381 = vsyncpa [#allocation3], 1 }
 0x2e1   :  { %382 = vsyncpa [#allocation5], 1 }
 0x2e2   :  { %383 = vsyncpa [#allocation8], 1 }

</bundles_post_ra>
